<compile_context>
chip_gen: v6e
topology: v6e:2x2x1
jax: 0.10.0
libtpu: 0.0.40
codegen_flags: <defaults>
</compile_context>

<pallas_src>
import functools

import jax
import jax.numpy as jnp
from jax import lax
from jax.experimental import pallas as pl
from jax.experimental.pallas import tpu as pltpu


_VMEM_LIMIT = 48 * 1024 * 1024   # explicit scoped-VMEM cap (< v7x 64 MiB physical)
_LN_EPS = 1e-5


def _round_up(x, m):
    return ((x + m - 1) // m) * m


def _pick_row_tile(m, cap=1024):
    """Largest 8-aligned row tile <= cap dividing round_up(m, 8)."""
    mp = _round_up(m, 8)
    t = min(cap, mp)
    t -= t % 8
    while t > 8 and mp % t != 0:
        t -= 8
    if mp % t != 0:
        t = 8
    return t, mp


def _pick_ln_rows(r, cap=256):
    """Row-tile for the (R,128) LayerNorm layout: divisor of R, 8-aligned, <= cap."""
    if r <= cap:
        return r
    t = cap - (cap % 8)
    while t >= 8:
        if r % t == 0:
            return t
        t -= 8
    return r   # rare fallback: whole sample in one block


# ----------------------------- Pallas kernels ------------------------------

def _conv_mm_kernel(p_ref, w_ref, b_ref, *o_refs):
    # (tm, K)bf16 @ (K, N)bf16 -> f32 acc, + (1, N) bias, split across outputs.
    acc = jnp.dot(p_ref[...], w_ref[...], preferred_element_type=jnp.float32)
    acc = acc + b_ref[...]
    off = 0
    for o in o_refs:
        c = o.shape[-1]
        o[...] = acc[:, off:off + c].astype(o.dtype)
        off += c


def _ln_stats_kernel(x_ref, mean_ref, rstd_ref, s_ref, q_ref, *, inv_n, eps):
    # Single-pass sum / sum-of-squares accumulation over D-tiles of one sample.
    j = pl.program_id(1)

    @pl.when(j == 0)
    def _():
        s_ref[...] = jnp.zeros_like(s_ref)
        q_ref[...] = jnp.zeros_like(q_ref)

    x = x_ref[...].astype(jnp.float32)            # (1, tR, 128)
    s_ref[...] += jnp.sum(x, axis=1)              # (1, 128)
    q_ref[...] += jnp.sum(x * x, axis=1)          # (1, 128)

    @pl.when(j == pl.num_programs(1) - 1)
    def _():
        total = jnp.sum(s_ref[...], axis=1, keepdims=True)      # (1, 1)
        total_sq = jnp.sum(q_ref[...], axis=1, keepdims=True)   # (1, 1)
        mean = total * inv_n
        var = total_sq * inv_n - mean * mean
        rstd = lax.rsqrt(var + eps)
        mean_ref[...] = jnp.broadcast_to(mean, mean_ref.shape)
        rstd_ref[...] = jnp.broadcast_to(rstd, rstd_ref.shape)


def _ln_norm_kernel(x_ref, mean_ref, rstd_ref, g_ref, b_ref, o_ref):
    x = x_ref[...].astype(jnp.float32)            # (1, tR, 128)
    m = mean_ref[...][0, 0:1, :]                  # (1, 128), all lanes equal
    r = rstd_ref[...][0, 0:1, :]
    y = (x - m) * r * g_ref[...] + b_ref[...]
    o_ref[...] = y.astype(o_ref.dtype)


# ----------------------------- Pallas wrappers ------------------------------

def conv3x3_s2_fused(x_nhwc, wk, bias, couts, tm_cap=1024):
    """Fused stride-2 3x3 convs sharing one NHWC input.

    wk:   prepared (Cin*9, sum(couts)) bf16 weight matrix (K ordered cin,kh,kw)
    bias: prepared (1, sum(couts)) f32 bias
    Returns a list of NHWC bf16 outputs, one per cout.  One bf16 im2col pass,
    one Pallas matmul, per-conv unpadded output stores (no slice round-trip).
    """
    x = x_nhwc.astype(jnp.bfloat16)
    B, H, W, C = x.shape
    Ho, Wo = H // 2, W // 2
    K = C * 9
    N = int(wk.shape[1])
    assert sum(couts) == N

    xp = jnp.pad(x, ((0, 0), (1, 1), (1, 1), (0, 0)))
    taps = [xp[:, kh:kh + 2 * Ho:2, kw:kw + 2 * Wo:2, :]      # each (B, Ho, Wo, C)
            for kh in range(3) for kw in range(3)]
    patches = jnp.stack(taps, axis=-1).reshape(B * Ho * Wo, K)   # bf16, single write

    M = B * Ho * Wo
    tm, Mp = _pick_row_tile(M, tm_cap)
    if Mp != M:
        patches = jnp.pad(patches, ((0, Mp - M), (0, 0)))

    out_shape = tuple(jax.ShapeDtypeStruct((Mp, c), jnp.bfloat16) for c in couts)
    out_specs = tuple(pl.BlockSpec((tm, c), lambda i: (i, 0)) for c in couts)

    outs = pl.pallas_call(
        _conv_mm_kernel,
        out_shape=out_shape,
        grid=(Mp // tm,),
        in_specs=[pl.BlockSpec((tm, K), lambda i: (i, 0)),
                  pl.BlockSpec((K, N), lambda i: (0, 0)),      # resident weights
                  pl.BlockSpec((1, N), lambda i: (0, 0))],     # resident bias
        out_specs=out_specs,
        compiler_params=pltpu.CompilerParams(
            dimension_semantics=("parallel",),
            vmem_limit_bytes=_VMEM_LIMIT),
    )(patches, wk, bias)

    results = []
    for o, c in zip(outs, couts):
        if Mp != M:
            o = o[:M]
        results.append(o.reshape(B, Ho, Wo, c))
    return results


def layernorm_nhwc(x_nhwc, g, b, eps=_LN_EPS):
    """nn.LayerNorm([C, H, W]) on an NHWC tensor (normalize over C,H,W per sample).

    Two-pass tiled Pallas LN: stats pass (sum/sumsq accumulation) then normalize
    pass; g/b are pre-laid-out (1, D//128, 128) f32 in NHWC flattening order.
    """
    B, H, W, C = x_nhwc.shape
    D = C * H * W
    assert D % 128 == 0, "LayerNorm feature size must be a multiple of 128"
    R = D // 128
    tR = _pick_ln_rows(R)
    nT = R // tR
    x = x_nhwc.reshape(B, R, 128)

    stats_kernel = functools.partial(_ln_stats_kernel, inv_n=1.0 / D, eps=eps)
    mean, rstd = pl.pallas_call(
        stats_kernel,
        out_shape=(jax.ShapeDtypeStruct((B, 8, 128), jnp.float32),
                   jax.ShapeDtypeStruct((B, 8, 128), jnp.float32)),
        grid=(B, nT),
        in_specs=[pl.BlockSpec((1, tR, 128), lambda i, j: (i, j, 0))],
        out_specs=(pl.BlockSpec((1, 8, 128), lambda i, j: (i, 0, 0)),
                   pl.BlockSpec((1, 8, 128), lambda i, j: (i, 0, 0))),
        scratch_shapes=[pltpu.VMEM((1, 128), jnp.float32),
                        pltpu.VMEM((1, 128), jnp.float32)],
        compiler_params=pltpu.CompilerParams(
            dimension_semantics=("parallel", "arbitrary"),
            vmem_limit_bytes=_VMEM_LIMIT),
    )(x)

    out = pl.pallas_call(
        _ln_norm_kernel,
        out_shape=jax.ShapeDtypeStruct((B, R, 128), jnp.bfloat16),
        grid=(B, nT),
        in_specs=[pl.BlockSpec((1, tR, 128), lambda i, j: (i, j, 0)),
                  pl.BlockSpec((1, 8, 128), lambda i, j: (i, 0, 0)),
                  pl.BlockSpec((1, 8, 128), lambda i, j: (i, 0, 0)),
                  pl.BlockSpec((1, tR, 128), lambda i, j: (0, j, 0)),
                  pl.BlockSpec((1, tR, 128), lambda i, j: (0, j, 0))],
        out_specs=pl.BlockSpec((1, tR, 128), lambda i, j: (i, j, 0)),
        compiler_params=pltpu.CompilerParams(
            dimension_semantics=("parallel", "parallel"),
            vmem_limit_bytes=_VMEM_LIMIT),
    )(x, mean, rstd, g, b)
    return out.reshape(B, H, W, C)


# --------------------------- module-level helpers ----------------------------

def img2token(x_nhwc):                # 'b h w c -> b (h w) c'  (pure reshape)
    B, H, W, C = x_nhwc.shape
    return x_nhwc.reshape(B, H * W, C)


def token2img(t, h, w):               # 'b (h w) c -> b h w c'  (pure reshape)
    B, N, C = t.shape
    return t.reshape(B, h, w, C)


def dual_block(att_h, att_l):
    # TODO(synk): DualBlock (dual high/low-frequency attention) source was not
    # provided with the module; identity passthrough keeps shapes/flow exact.
    return att_h, att_l


def shift_patch_merge(x_nhwc):
    # TODO(synk): ShiftPatchMerge source was not provided; deterministic shifted
    # stride-2 spatial subsampling surrogate (channels preserved, spatial halved).
    x_h = x_nhwc[:, 0::2, 0::2, :]
    x_l = x_nhwc[:, 1::2, 1::2, :]
    return x_h, x_l


# ------------------------------- parameters ----------------------------------

def init_encoder_params(key, img_size, dim_in, embed_dim):
    res = img_size // 2

    def conv_params(k, cin, cout):
        kw, kb = jax.random.split(k)
        w = jax.random.normal(kw, (cout, cin, 3, 3), jnp.float32) / jnp.sqrt(cin * 9.0)
        b = jax.random.normal(kb, (cout,), jnp.float32) * 0.01
        return w, b

    keys = jax.random.split(key, 3)
    p = {}
    p["ope_w"], p["ope_b"] = conv_params(keys[0], dim_in, embed_dim)
    p["ln_g"] = jnp.ones((embed_dim, res, res), jnp.float32)      # PyTorch LN default
    p["ln_b"] = jnp.zeros((embed_dim, res, res), jnp.float32)
    p["conv1_w"], p["conv1_b"] = conv_params(keys[1], embed_dim, embed_dim)
    p["conv2_w"], p["conv2_b"] = conv_params(keys[2], embed_dim, embed_dim)
    return p


def _pack_matmul_weights(ws, bs):
    """(Cout,Cin,3,3) PyTorch weights -> (Cin*9, sum(Cout)) bf16, bias (1, N) f32."""
    couts = [int(w.shape[0]) for w in ws]
    K = int(ws[0].shape[1]) * 9
    wk = jnp.concatenate([w.reshape(c, K).T for w, c in zip(ws, couts)],
                         axis=1).astype(jnp.bfloat16)
    bias = jnp.concatenate(list(bs)).astype(jnp.float32).reshape(1, -1)
    return wk, bias


def prepare_encoder_params(raw, img_size):
    """One-time re-layout of parameters (hoisted out of the forward hot path)."""
    res = img_size // 2
    embed_dim = int(raw["ope_w"].shape[0])
    cin = int(raw["ope_w"].shape[1])
    p = {}
    if cin * 9 >= 32:
        p["ope_wk"], p["ope_bias"] = _pack_matmul_weights([raw["ope_w"]], [raw["ope_b"]])
    else:
        # Tiny-K first conv (dim_in small): a Pallas matmul would pad K/lanes
        # >10x (worst on v5e) -> let XLA handle it in f32 (also best precision
        # on raw image data).
        p["ope_w_hwio"] = jnp.transpose(raw["ope_w"], (2, 3, 1, 0)).astype(jnp.float32)
        p["ope_b"] = raw["ope_b"].astype(jnp.float32)
    R = embed_dim * res * res // 128
    p["ln_g"] = raw["ln_g"].transpose(1, 2, 0).reshape(1, R, 128).astype(jnp.float32)
    p["ln_b"] = raw["ln_b"].transpose(1, 2, 0).reshape(1, R, 128).astype(jnp.float32)
    p["c12_wk"], p["c12_bias"] = _pack_matmul_weights(
        [raw["conv1_w"], raw["conv2_w"]], [raw["conv1_b"], raw["conv2_b"]])
    return p


# ------------------------------- Encoder model -------------------------------

def first_fusion_stage(params, x_nhwc, depth):
    if "ope_wk" in params:
        (x,) = conv3x3_s2_fused(x_nhwc, params["ope_wk"], params["ope_bias"],
                                (int(params["ope_wk"].shape[1]),))
    else:
        x = lax.conv_general_dilated(
            x_nhwc.astype(jnp.float32), params["ope_w_hwio"],
            window_strides=(2, 2), padding=((1, 1), (1, 1)),
            dimension_numbers=("NHWC", "HWIO", "NHWC"))
        x = (x + params["ope_b"]).astype(jnp.bfloat16)
    x = layernorm_nhwc(x, params["ln_g"], params["ln_b"])            # bf16 in/out
    n = int(params["c12_wk"].shape[1])
    # conv1 & conv2 share the same input: one bf16 im2col, one fused matmul,
    # two unpadded bf16 outputs (no slice round-trip).
    x_l, x_h = conv3x3_s2_fused(x, params["c12_wk"], params["c12_bias"],
                                (n // 2, n // 2))
    att_l = img2token(x_l)
    att_h = img2token(x_h)
    for _ in range(depth):
        att_h, att_l = dual_block(att_h, att_l)
    h, w = x_l.shape[1], x_l.shape[2]
    att_h = token2img(att_h, h, w) + x_h          # residual add left to XLA (fused)
    att_l = token2img(att_l, h, w) + x_l
    return jnp.concatenate([att_h, att_l], axis=-1)


def encoder_fusion_stage(x_nhwc, depth):
    x_h, x_l = shift_patch_merge(x_nhwc)
    att_h = img2token(x_h)
    att_l = img2token(x_l)
    for _ in range(depth):
        att_h, att_l = dual_block(att_h, att_l)
    h, w = x_h.shape[1], x_h.shape[2]
    att_h = token2img(att_h, h, w) + x_h
    att_l = token2img(att_l, h, w) + x_l
    return jnp.concatenate([att_h, att_l], axis=-1)


def encoder_forward(params, x_nchw, depths):
    """Args: x: B C H W (NCHW, like the PyTorch module). Returns NCHW f32 skips."""
    x = jnp.transpose(x_nchw, (0, 2, 3, 1))                  # one-time NCHW -> NHWC
    skips = []
    x = first_fusion_stage(params, x, depths[0])
    skips.append(x)
    for i in range(1, len(depths)):
        x = encoder_fusion_stage(x, depths[i])
        skips.append(x)
    # Interface fidelity: NCHW f32 skips like the PyTorch module (fused with the
    # layout transpose).
    return tuple(jnp.transpose(s, (0, 3, 1, 2)).astype(jnp.float32) for s in skips)


# ----------------------------------- main ------------------------------------

if __name__ == "__main__":
    img_size, dim_in, embed_dim = 32, 1, 8          # small, 4-stage-compatible shapes
    depths = (2, 3, 8, 3)                           # matches Encoder defaults

    key = jax.random.PRNGKey(0)
    kparam, kx = jax.random.split(key)
    raw_params = init_encoder_params(kparam, img_size, dim_in, embed_dim)
    params = prepare_encoder_params(raw_params, img_size)   # one-time re-layout
    x = jax.random.normal(kx, (2, dim_in, img_size, img_size), jnp.float32)

    fwd = jax.jit(lambda p, inp: encoder_forward(p, inp, depths))
    skips = jax.block_until_ready(fwd(params, x))

    # sanity: stage i output has channels embed_dim*2^(i+1), spatial img_size/2^(i+2)
    expected = [(2, embed_dim * 2 ** (i + 1), img_size // 2 ** (i + 2),
                 img_size // 2 ** (i + 2)) for i in range(4)]
    assert tuple(s.shape for s in skips) == tuple(expected)
    assert all(bool(jnp.isfinite(s).all()) for s in skips)

    print("KERNEL_OK")
</pallas_src>

<mosaic_0001>
module attributes {stable_mosaic.version = 11 : i64} {
  func.func @_ln_stats_kernel(%arg0: i32, %arg1: i32, %arg2: memref<1x16x128xbf16, #tpu.memory_space<vmem>>, %arg3: memref<1x8x128xf32, #tpu.memory_space<vmem>>, %arg4: memref<1x8x128xf32, #tpu.memory_space<vmem>>, %arg5: memref<1x128xf32, #tpu.memory_space<vmem>>, %arg6: memref<1x128xf32, #tpu.memory_space<vmem>>) attributes {dimension_semantics = [#tpu.dimension_semantics<parallel>, #tpu.dimension_semantics<arbitrary>], iteration_bounds = array<i64: 2, 1>, scalar_prefetch = 0 : i64, scratch_operands = 2 : i64, tpu.core_type = #tpu.core_type<tc>, window_params = [{transform_indices = @transform_0, window_bounds = array<i64: 1, 16, 128>}, {transform_indices = @transform_1, window_bounds = array<i64: 1, 8, 128>}, {transform_indices = @transform_2, window_bounds = array<i64: 1, 8, 128>}]} {
    %c0_i32 = arith.constant 0 : i32
    %0 = arith.cmpi eq, %arg1, %c0_i32 : i32
    %1 = arith.extui %0 : i1 to i32
    %c0_i32_0 = arith.constant 0 : i32
    %2 = arith.cmpi ne, %1, %c0_i32_0 : i32
    scf.if %2 {
      %cst_14 = arith.constant 0.000000e+00 : f32
      %17 = vector.broadcast %cst_14 : f32 to vector<1x128xf32>
      %c0_15 = arith.constant 0 : index
      %c0_16 = arith.constant 0 : index
      %18 = vector.load %arg5[%c0_15, %c0_16] : memref<1x128xf32, #tpu.memory_space<vmem>>, vector<1x128xf32>
      tpu.vector_store %arg5[%c0_15, %c0_16], %17 {strides = array<i32>} : memref<1x128xf32, #tpu.memory_space<vmem>>, vector<1x128xf32>,
      %cst_17 = arith.constant 0.000000e+00 : f32
      %19 = vector.broadcast %cst_17 : f32 to vector<1x128xf32>
      %c0_18 = arith.constant 0 : index
      %c0_19 = arith.constant 0 : index
      %20 = vector.load %arg6[%c0_18, %c0_19] : memref<1x128xf32, #tpu.memory_space<vmem>>, vector<1x128xf32>
      tpu.vector_store %arg6[%c0_18, %c0_19], %19 {strides = array<i32>} : memref<1x128xf32, #tpu.memory_space<vmem>>, vector<1x128xf32>,
    } else {
    }
    %c0 = arith.constant 0 : index
    %c0_1 = arith.constant 0 : index
    %c0_2 = arith.constant 0 : index
    %3 = vector.load %arg2[%c0, %c0_1, %c0_2] : memref<1x16x128xbf16, #tpu.memory_space<vmem>>, vector<1x16x128xbf16>
    %4 = arith.extf %3 : vector<1x16x128xbf16> to vector<1x16x128xf32>
    %c0_3 = arith.constant 0 : index
    %c0_4 = arith.constant 0 : index
    %5 = vector.load %arg5[%c0_3, %c0_4] : memref<1x128xf32, #tpu.memory_space<vmem>>, vector<1x128xf32>
    %cst = arith.constant dense<0.000000e+00> : vector<1x128xf32>
    %6 = vector.multi_reduction <add>, %4, %cst [1] : vector<1x16x128xf32> to vector<1x128xf32>
    %7 = arith.addf %5, %6 : vector<1x128xf32>
    %c0_5 = arith.constant 0 : index
    %c0_6 = arith.constant 0 : index
    %8 = vector.load %arg5[%c0_5, %c0_6] : memref<1x128xf32, #tpu.memory_space<vmem>>, vector<1x128xf32>
    tpu.vector_store %arg5[%c0_5, %c0_6], %7 {strides = array<i32>} : memref<1x128xf32, #tpu.memory_space<vmem>>, vector<1x128xf32>,
    %c0_7 = arith.constant 0 : index
    %c0_8 = arith.constant 0 : index
    %9 = vector.load %arg6[%c0_7, %c0_8] : memref<1x128xf32, #tpu.memory_space<vmem>>, vector<1x128xf32>
    %10 = arith.mulf %4, %4 : vector<1x16x128xf32>
    %cst_9 = arith.constant dense<0.000000e+00> : vector<1x128xf32>
    %11 = vector.multi_reduction <add>, %10, %cst_9 [1] : vector<1x16x128xf32> to vector<1x128xf32>
    %12 = arith.addf %9, %11 : vector<1x128xf32>
    %c0_10 = arith.constant 0 : index
    %c0_11 = arith.constant 0 : index
    %13 = vector.load %arg6[%c0_10, %c0_11] : memref<1x128xf32, #tpu.memory_space<vmem>>, vector<1x128xf32>
    tpu.vector_store %arg6[%c0_10, %c0_11], %12 {strides = array<i32>} : memref<1x128xf32, #tpu.memory_space<vmem>>, vector<1x128xf32>,
    %c0_i32_12 = arith.constant 0 : i32
    %14 = arith.cmpi eq, %arg1, %c0_i32_12 : i32
    %15 = arith.extui %14 : i1 to i32
    %c0_i32_13 = arith.constant 0 : i32
    %16 = arith.cmpi ne, %15, %c0_i32_13 : i32
    scf.if %16 {
      %c0_14 = arith.constant 0 : index
      %c0_15 = arith.constant 0 : index
      %17 = vector.load %arg5[%c0_14, %c0_15] : memref<1x128xf32, #tpu.memory_space<vmem>>, vector<1x128xf32>
      %cst_16 = arith.constant dense<0.000000e+00> : vector<1xf32>
      %18 = vector.multi_reduction <add>, %17, %cst_16 [1] : vector<1x128xf32> to vector<1xf32>
      %19 = vector.shape_cast %18 : vector<1xf32> to vector<1x1xf32>
      %c0_17 = arith.constant 0 : index
      %c0_18 = arith.constant 0 : index
      %20 = vector.load %arg6[%c0_17, %c0_18] : memref<1x128xf32, #tpu.memory_space<vmem>>, vector<1x128xf32>
      %cst_19 = arith.constant dense<0.000000e+00> : vector<1xf32>
      %21 = vector.multi_reduction <add>, %20, %cst_19 [1] : vector<1x128xf32> to vector<1xf32>
      %22 = vector.shape_cast %21 : vector<1xf32> to vector<1x1xf32>
      %cst_20 = arith.constant 4.8828125E-4 : f32
      %23 = vector.broadcast %cst_20 : f32 to vector<1x1xf32>
      %24 = arith.mulf %19, %23 : vector<1x1xf32>
      %cst_21 = arith.constant 4.8828125E-4 : f32
      %25 = vector.broadcast %cst_21 : f32 to vector<1x1xf32>
      %26 = arith.mulf %22, %25 : vector<1x1xf32>
      %27 = arith.mulf %24, %24 : vector<1x1xf32>
      %28 = arith.subf %26, %27 : vector<1x1xf32>
      %cst_22 = arith.constant 9.99999974E-6 : f32
      %29 = vector.broadcast %cst_22 : f32 to vector<1x1xf32>
      %30 = arith.addf %28, %29 : vector<1x1xf32>
      %31 = math.rsqrt %30 : vector<1x1xf32>
      %32 = vector.shape_cast %24 : vector<1x1xf32> to vector<1x1x1xf32>
      %33 = vector.broadcast %32 : vector<1x1x1xf32> to vector<1x8x128xf32>
      %c0_23 = arith.constant 0 : index
      %c0_24 = arith.constant 0 : index
      %c0_25 = arith.constant 0 : index
      %34 = vector.load %arg3[%c0_23, %c0_24, %c0_25] : memref<1x8x128xf32, #tpu.memory_space<vmem>>, vector<1x8x128xf32>
      tpu.vector_store %arg3[%c0_23, %c0_24, %c0_25], %33 {strides = array<i32>} : memref<1x8x128xf32, #tpu.memory_space<vmem>>, vector<1x8x128xf32>,
      %35 = vector.shape_cast %31 : vector<1x1xf32> to vector<1x1x1xf32>
      %36 = vector.broadcast %35 : vector<1x1x1xf32> to vector<1x8x128xf32>
      %c0_26 = arith.constant 0 : index
      %c0_27 = arith.constant 0 : index
      %c0_28 = arith.constant 0 : index
      %37 = vector.load %arg4[%c0_26, %c0_27, %c0_28] : memref<1x8x128xf32, #tpu.memory_space<vmem>>, vector<1x8x128xf32>
      tpu.vector_store %arg4[%c0_26, %c0_27, %c0_28], %36 {strides = array<i32>} : memref<1x8x128xf32, #tpu.memory_space<vmem>>, vector<1x8x128xf32>,
    } else {
    }
    return
  }
  func.func @transform_0(%arg0: i32, %arg1: i32) -> (i32, i32, i32) {
    %c0_i32 = arith.constant 0 : i32
    %c0_i32_0 = arith.constant 0 : i32
    return %arg0, %arg1, %c0_i32 : i32, i32, i32
  }
  func.func @transform_1(%arg0: i32, %arg1: i32) -> (i32, i32, i32) {
    %c0_i32 = arith.constant 0 : i32
    %c0_i32_0 = arith.constant 0 : i32
    %c0_i32_1 = arith.constant 0 : i32
    return %arg0, %c0_i32, %c0_i32_0 : i32, i32, i32
  }
  func.func @transform_2(%arg0: i32, %arg1: i32) -> (i32, i32, i32) {
    %c0_i32 = arith.constant 0 : i32
    %c0_i32_0 = arith.constant 0 : i32
    %c0_i32_1 = arith.constant 0 : i32
    return %arg0, %c0_i32, %c0_i32_0 : i32, i32, i32
  }
}

module attributes {stable_mosaic.version = 11 : i64} {
  func.func @_ln_norm_kernel(%arg0: i32, %arg1: i32, %arg2: memref<1x16x128xbf16, #tpu.memory_space<vmem>>, %arg3: memref<1x8x128xf32, #tpu.memory_space<vmem>>, %arg4: memref<1x8x128xf32, #tpu.memory_space<vmem>>, %arg5: memref<1x16x128xf32, #tpu.memory_space<vmem>>, %arg6: memref<1x16x128xf32, #tpu.memory_space<vmem>>, %arg7: memref<1x16x128xbf16, #tpu.memory_space<vmem>>) attributes {dimension_semantics = [#tpu.dimension_semantics<parallel>, #tpu.dimension_semantics<parallel>], iteration_bounds = array<i64: 2, 1>, scalar_prefetch = 0 : i64, scratch_operands = 0 : i64, tpu.core_type = #tpu.core_type<tc>, window_params = [{transform_indices = @transform_0, window_bounds = array<i64: 1, 16, 128>}, {transform_indices = @transform_1, window_bounds = array<i64: 1, 8, 128>}, {transform_indices = @transform_2, window_bounds = array<i64: 1, 8, 128>}, {transform_indices = @transform_3, window_bounds = array<i64: 1, 16, 128>}, {transform_indices = @transform_4, window_bounds = array<i64: 1, 16, 128>}, {transform_indices = @transform_5, window_bounds = array<i64: 1, 16, 128>}]} {
    %c0 = arith.constant 0 : index
    %c0_0 = arith.constant 0 : index
    %c0_1 = arith.constant 0 : index
    %0 = vector.load %arg2[%c0, %c0_0, %c0_1] : memref<1x16x128xbf16, #tpu.memory_space<vmem>>, vector<1x16x128xbf16>
    %1 = arith.extf %0 : vector<1x16x128xbf16> to vector<1x16x128xf32>
    %c0_2 = arith.constant 0 : index
    %c0_3 = arith.constant 0 : index
    %c0_4 = arith.constant 0 : index
    %2 = vector.load %arg3[%c0_2, %c0_3, %c0_4] : memref<1x8x128xf32, #tpu.memory_space<vmem>>, vector<1x8x128xf32>
    %3 = vector.extract_strided_slice %2 {offsets = [0, 0, 0], sizes = [1, 1, 128], strides = [1, 1, 1]} : vector<1x8x128xf32> to vector<1x1x128xf32>
    %4 = vector.shape_cast %3 : vector<1x1x128xf32> to vector<1x128xf32>
    %c0_5 = arith.constant 0 : index
    %c0_6 = arith.constant 0 : index
    %c0_7 = arith.constant 0 : index
    %5 = vector.load %arg4[%c0_5, %c0_6, %c0_7] : memref<1x8x128xf32, #tpu.memory_space<vmem>>, vector<1x8x128xf32>
    %6 = vector.extract_strided_slice %5 {offsets = [0, 0, 0], sizes = [1, 1, 128], strides = [1, 1, 1]} : vector<1x8x128xf32> to vector<1x1x128xf32>
    %7 = vector.shape_cast %6 : vector<1x1x128xf32> to vector<1x128xf32>
    %8 = vector.shape_cast %4 : vector<1x128xf32> to vector<1x1x128xf32>
    %9 = vector.broadcast %8 : vector<1x1x128xf32> to vector<1x16x128xf32>
    %10 = arith.subf %1, %9 : vector<1x16x128xf32>
    %11 = vector.shape_cast %7 : vector<1x128xf32> to vector<1x1x128xf32>
    %12 = vector.broadcast %11 : vector<1x1x128xf32> to vector<1x16x128xf32>
    %13 = arith.mulf %10, %12 : vector<1x16x128xf32>
    %c0_8 = arith.constant 0 : index
    %c0_9 = arith.constant 0 : index
    %c0_10 = arith.constant 0 : index
    %14 = vector.load %arg5[%c0_8, %c0_9, %c0_10] : memref<1x16x128xf32, #tpu.memory_space<vmem>>, vector<1x16x128xf32>
    %15 = arith.mulf %13, %14 : vector<1x16x128xf32>
    %c0_11 = arith.constant 0 : index
    %c0_12 = arith.constant 0 : index
    %c0_13 = arith.constant 0 : index
    %16 = vector.load %arg6[%c0_11, %c0_12, %c0_13] : memref<1x16x128xf32, #tpu.memory_space<vmem>>, vector<1x16x128xf32>
    %17 = arith.addf %15, %16 : vector<1x16x128xf32>
    %18 = arith.truncf %17 : vector<1x16x128xf32> to vector<1x16x128xbf16>
    %c0_14 = arith.constant 0 : index
    %c0_15 = arith.constant 0 : index
    %c0_16 = arith.constant 0 : index
    %19 = vector.load %arg7[%c0_14, %c0_15, %c0_16] : memref<1x16x128xbf16, #tpu.memory_space<vmem>>, vector<1x16x128xbf16>
    tpu.vector_store %arg7[%c0_14, %c0_15, %c0_16], %18 {strides = array<i32>} : memref<1x16x128xbf16, #tpu.memory_space<vmem>>, vector<1x16x128xbf16>,
    return
  }
  func.func @transform_0(%arg0: i32, %arg1: i32) -> (i32, i32, i32) {
    %c0_i32 = arith.constant 0 : i32
    %c0_i32_0 = arith.constant 0 : i32
    return %arg0, %arg1, %c0_i32 : i32, i32, i32
  }
  func.func @transform_1(%arg0: i32, %arg1: i32) -> (i32, i32, i32) {
    %c0_i32 = arith.constant 0 : i32
    %c0_i32_0 = arith.constant 0 : i32
    %c0_i32_1 = arith.constant 0 : i32
    return %arg0, %c0_i32, %c0_i32_0 : i32, i32, i32
  }
  func.func @transform_2(%arg0: i32, %arg1: i32) -> (i32, i32, i32) {
    %c0_i32 = arith.constant 0 : i32
    %c0_i32_0 = arith.constant 0 : i32
    %c0_i32_1 = arith.constant 0 : i32
    return %arg0, %c0_i32, %c0_i32_0 : i32, i32, i32
  }
  func.func @transform_3(%arg0: i32, %arg1: i32) -> (i32, i32, i32) {
    %c0_i32 = arith.constant 0 : i32
    %c0_i32_0 = arith.constant 0 : i32
    %c0_i32_1 = arith.constant 0 : i32
    return %c0_i32, %arg1, %c0_i32_0 : i32, i32, i32
  }
  func.func @transform_4(%arg0: i32, %arg1: i32) -> (i32, i32, i32) {
    %c0_i32 = arith.constant 0 : i32
    %c0_i32_0 = arith.constant 0 : i32
    %c0_i32_1 = arith.constant 0 : i32
    return %c0_i32, %arg1, %c0_i32_0 : i32, i32, i32
  }
  func.func @transform_5(%arg0: i32, %arg1: i32) -> (i32, i32, i32) {
    %c0_i32 = arith.constant 0 : i32
    %c0_i32_0 = arith.constant 0 : i32
    return %arg0, %arg1, %c0_i32 : i32, i32, i32
  }
}

module attributes {stable_mosaic.version = 11 : i64} {
  func.func @_conv_mm_kernel(%arg0: i32, %arg1: memref<128x72xbf16, #tpu.memory_space<vmem>>, %arg2: memref<72x16xbf16, #tpu.memory_space<vmem>>, %arg3: memref<1x16xf32, #tpu.memory_space<vmem>>, %arg4: memref<128x8xbf16, #tpu.memory_space<vmem>>, %arg5: memref<128x8xbf16, #tpu.memory_space<vmem>>) attributes {dimension_semantics = [#tpu.dimension_semantics<parallel>], iteration_bounds = array<i64: 1>, scalar_prefetch = 0 : i64, scratch_operands = 0 : i64, tpu.core_type = #tpu.core_type<tc>, window_params = [{transform_indices = @transform_0, window_bounds = array<i64: 128, 72>}, {pipeline_mode = #tpu.pipeline_mode<synchronous>, transform_indices = @transform_1, window_bounds = array<i64: 72, 16>}, {pipeline_mode = #tpu.pipeline_mode<synchronous>, transform_indices = @transform_2, window_bounds = array<i64: 1, 16>}, {transform_indices = @transform_3, window_bounds = array<i64: 128, 8>}, {transform_indices = @transform_4, window_bounds = array<i64: 128, 8>}]} {
    %c0 = arith.constant 0 : index
    %c0_0 = arith.constant 0 : index
    %0 = vector.load %arg1[%c0, %c0_0] : memref<128x72xbf16, #tpu.memory_space<vmem>>, vector<128x72xbf16>
    %c0_1 = arith.constant 0 : index
    %c0_2 = arith.constant 0 : index
    %1 = vector.load %arg2[%c0_1, %c0_2] : memref<72x16xbf16, #tpu.memory_space<vmem>>, vector<72x16xbf16>
    %cst = arith.constant dense<0.000000e+00> : vector<128x16xf32>
    %2 = tpu.matmul %0, %1, %cst {dimension_numbers = #tpu.dot_dimension_numbers<[1], [0], [0], [1], [0, 0, 1, 1], [], []>} : vector<128x72xbf16>, vector<72x16xbf16>, vector<128x16xf32> -> vector<128x16xf32>
    %c0_3 = arith.constant 0 : index
    %c0_4 = arith.constant 0 : index
    %3 = vector.load %arg3[%c0_3, %c0_4] : memref<1x16xf32, #tpu.memory_space<vmem>>, vector<1x16xf32>
    %4 = vector.broadcast %3 : vector<1x16xf32> to vector<128x16xf32>
    %5 = arith.addf %2, %4 : vector<128x16xf32>
    %6 = vector.extract_strided_slice %5 {offsets = [0, 0], sizes = [128, 8], strides = [1, 1]} : vector<128x16xf32> to vector<128x8xf32>
    %7 = arith.truncf %6 : vector<128x8xf32> to vector<128x8xbf16>
    %c0_5 = arith.constant 0 : index
    %c0_6 = arith.constant 0 : index
    %8 = vector.load %arg4[%c0_5, %c0_6] : memref<128x8xbf16, #tpu.memory_space<vmem>>, vector<128x8xbf16>
    tpu.vector_store %arg4[%c0_5, %c0_6], %7 {strides = array<i32>} : memref<128x8xbf16, #tpu.memory_space<vmem>>, vector<128x8xbf16>,
    %9 = vector.extract_strided_slice %5 {offsets = [0, 8], sizes = [128, 8], strides = [1, 1]} : vector<128x16xf32> to vector<128x8xf32>
    %10 = arith.truncf %9 : vector<128x8xf32> to vector<128x8xbf16>
    %c0_7 = arith.constant 0 : index
    %c0_8 = arith.constant 0 : index
    %11 = vector.load %arg5[%c0_7, %c0_8] : memref<128x8xbf16, #tpu.memory_space<vmem>>, vector<128x8xbf16>
    tpu.vector_store %arg5[%c0_7, %c0_8], %10 {strides = array<i32>} : memref<128x8xbf16, #tpu.memory_space<vmem>>, vector<128x8xbf16>,
    return
  }
  func.func @transform_0(%arg0: i32) -> (i32, i32) {
    %c0_i32 = arith.constant 0 : i32
    %c0_i32_0 = arith.constant 0 : i32
    return %arg0, %c0_i32 : i32, i32
  }
  func.func @transform_1(%arg0: i32) -> (i32, i32) {
    %c0_i32 = arith.constant 0 : i32
    %c0_i32_0 = arith.constant 0 : i32
    %c0_i32_1 = arith.constant 0 : i32
    return %c0_i32, %c0_i32_0 : i32, i32
  }
  func.func @transform_2(%arg0: i32) -> (i32, i32) {
    %c0_i32 = arith.constant 0 : i32
    %c0_i32_0 = arith.constant 0 : i32
    %c0_i32_1 = arith.constant 0 : i32
    return %c0_i32, %c0_i32_0 : i32, i32
  }
  func.func @transform_3(%arg0: i32) -> (i32, i32) {
    %c0_i32 = arith.constant 0 : i32
    %c0_i32_0 = arith.constant 0 : i32
    return %arg0, %c0_i32 : i32, i32
  }
  func.func @transform_4(%arg0: i32) -> (i32, i32) {
    %c0_i32 = arith.constant 0 : i32
    %c0_i32_0 = arith.constant 0 : i32
    return %arg0, %c0_i32 : i32, i32
  }
}

</mosaic_0001>

<bundles_post_ra>
// kernel: _lambda_.4
= control target key start
LH: loop header
LB: loop body
LE: loop exit
PB: predicated region body
PF: predicated region fallthrough
CT: control target
= control target key end

     0   :  { %s627_s18 = smov 0   ;;  %s629_s19 = smov 0   ;;  %s678_s0 = inlined_call_operand.vmem [shape: bf16[2,16,128], index: 0, kind: input, shape index: {}]   ;;  %s679_s1 = inlined_call_operand.vmem [shape: f32[2,8,128], index: 1, kind: input, shape index: {}]   ;;  %s680_s2 = inlined_call_operand.vmem [shape: f32[2,8,128], index: 2, kind: input, shape index: {}]   ;;  %s681_s3 = inlined_call_operand.vmem [shape: f32[1,16,128], index: 3, kind: input, shape index: {}]   ;;  %s682_s4 = inlined_call_operand.vmem [shape: f32[1,16,128], index: 4, kind: input, shape index: {}]   ;;  %s683_s5 = inlined_call_operand.vmem [shape: bf16[2,16,128], index: 5, kind: output, shape index: {}]  }
   0x1   :  { %s631_s20 = smov 0  }
   0x2 LB: > { %s27_s21 = sadd.s32 1, %s591_s19  ;;  %p525_p0 = scmp.ge.s32.totalorder %s595_s20, 1  ;;  %s595_s20 = sphi %s631_s20, %s15_s20   ;;  %s591_s19 = sphi %s629_s19, %s685_s19   ;;  %s587_s18 = sphi %s627_s18, %s684_s18  }
   0x3   : > { %p29_p1 = scmp.ge.s32.totalorder %s27_s21, 2  ;;  %p248_p2 = scmp.lt.s32.totalorder %s595_s20, 3 }
   0x5   : > { %s687_s21 = smov (%p29_p1, %s27_s21), 0  ;;  %p249_p3 = pnand %p525_p0, %p248_p2 }
   0x6   : > { %p303_p4 = scmp.lt.s32.totalorder (!%p249_p3), %s587_s18, 1 }
   0x7   : > { %252 = sbr.rel (%p249_p3) target bundleno = 31 (0x1f), region = 40 }
   0xc   : > { %v348_v0 = vlaneseq  ;;  %s689_s18 = smov (!%p303_p4, %s587_s18), 1  ;;  %v360_v12 = vld [vmem:[%s681_s3] sm:$0xff]  ;;  %v361_v13 = vld [vmem:[%s681_s3 + $0x8] sm:$0xff] }
   0xd   : > { %s536_s22 = sshll.u32 %s689_s18, 3  ;;  %v364_v16 = vld [vmem:[%s682_s4] sm:$0xff]  ;;  %v365_v17 = vld [vmem:[%s682_s4 + $0x8] sm:$0xff] }
   0xe   : > { %v349_v1 = vshrl.u32 %v348_v0, 7  ;;  %s310_s25 = scalar_lea.vmem %s678_s0, %s536_s22  ;;  %s315_s28 = scalar_lea.vmem %s679_s1, %s536_s22 }
   0xf   : > { %s319_s6 = scalar_lea.vmem %s680_s2, %s536_s22  ;;  %v541_v3 = vld [vmem:[%s310_s25] sm:$0xff]   ;;  %s340_s17 = scalar_lea.vmem %s683_s5, %s536_s22 }
  0x10   : > { %v350_v2 = vsub.s32 0, %v349_v1  ;;  %v346_v4 = vld [vmem:[%s315_s28] sm:$0xff]  ;;  %v542_v5 = vunpack.c.l.bf16 %v541_v3  ;;  %v543_v6 = vunpack.c.h.bf16 %v541_v3 }
  0x11   : > { %v347_v7 = vld [vmem:[%s319_s6] sm:$0xff] }
  0x12   : > { %v351_v8 = vrot.slane %v346_v4, %v350_v2  ;;  %v357_v9 = vrot.slane %v347_v7, %v350_v2 }
  0x14   : > { %v352_v10 = vsub.f32 %v542_v5, %v351_v8  ;;  %v353_v11 = vsub.f32 %v543_v6, %v351_v8 }
  0x16   : > { %v358_v14 = vmul.f32 %v357_v9, %v352_v10  ;;  %v359_v15 = vmul.f32 %v357_v9, %v353_v11 }
  0x18   : > { %v362_v18 = vmul.f32 %v360_v12, %v358_v14  ;;  %v363_v19 = vmul.f32 %v361_v13, %v359_v15 }
  0x1a   : > { %v366_v20 = vadd.f32 %v364_v16, %v362_v18  ;;  %v367_v21 = vadd.f32 %v365_v17, %v363_v19 }
  0x1c   : > { %v547_v22 = vpack.c.bf16 %v367_v21, %v366_v20 }
  0x1e   : > { %548 = vst [vmem:[%s340_s17] sm:$0xff] %v547_v22  }
  0x1f PF: > { %s15_s20 = sadd.s32 1, %s595_s20   ;;  %s684_s18 = smov %s591_s19 }
  0x20   : > { %p12_p5 = scmp.ge.s32.totalorder %s15_s20, 4   ;;  %s685_s19 = smov %s687_s21 }
  0x22   :  { %14 = sbr.rel (!%p12_p5) target bundleno = 2 (0x2), region = 82 }

// kernel: _lambda_.3
= control target key start
LH: loop header
LB: loop body
LE: loop exit
PB: predicated region body
PF: predicated region fallthrough
CT: control target
= control target key end

     0   :  { %s422_s9 = smov 0   ;;  %s424_s10 = smov 0   ;;  %s463_s0 = inlined_call_operand.vmem [shape: bf16[2,16,128], index: 0, kind: input, shape index: {}]   ;;  %s464_s1 = inlined_call_operand.vmem [shape: f32[2,8,128], index: 1, kind: output, shape index: {0}]   ;;  %s465_s2 = inlined_call_operand.vmem [shape: f32[2,8,128], index: 2, kind: output, shape index: {1}]  }
   0x1   :  { %s426_s11 = smov 0  }
   0x2 LB: > { %s25_s12 = sadd.s32 1, %s400_s10  ;;  %p343_p0 = scmp.ge.s32.totalorder %s404_s11, 1  ;;  %s404_s11 = sphi %s426_s11, %s13_s11   ;;  %s400_s10 = sphi %s424_s10, %s467_s10   ;;  %s396_s9 = sphi %s422_s9, %s466_s9  }
   0x3   : > { %p27_p1 = scmp.ge.s32.totalorder %s25_s12, 2  ;;  %p134_p2 = scmp.lt.s32.totalorder %s404_s11, 3 }
   0x5   : > { %s469_s12 = smov (%p27_p1, %s25_s12), 0  ;;  %p135_p3 = pnand %p343_p0, %p134_p2 }
   0x6   : > { %p164_p4 = scmp.lt.s32.totalorder (!%p135_p3), %s396_s9, 1 }
   0x7   : > { %138 = sbr.rel (%p135_p3) target bundleno = 208 (0xd0), region = 24 }
   0xc   : > { %v406_v0 = vmov 0.0   ;;  %s471_s9 = smov (!%p164_p4, %s396_s9), 1  ;;  %vm217_vm0 = vcmask 1040384   ;;  %v231_v28 = vlaneseq }
   0xd   : > { %185 = vst [vmem:[#allocation2] sm:$0x1] %v406_v0  ;;  %186 = vst [vmem:[#allocation3] sm:$0x1] %v406_v0  ;;  %s440_s13 = sshll.u32 %s471_s9, 3 }
   0xe   : > { %s171_s16 = scalar_lea.vmem %s463_s0, %s440_s13  ;;  %v232_v29 = vshrl.u32 %v231_v28, 7  ;;  %s176_s19 = scalar_lea.vmem %s464_s1, %s440_s13 }
   0xf   : > { %v352_v1 = vld [vmem:[%s171_s16] sm:$0xff]   ;;  %s180_s22 = scalar_lea.vmem %s465_s2, %s440_s13 }
  0x10   : > { %v353_v2 = vunpack.c.l.bf16 %v352_v1  ;;  %v354_v3 = vunpack.c.h.bf16 %v352_v1  ;;  %v233_v30 = vsub.s32 0, %v232_v29 }
  0x12   : > { %v192_v4 = vadd.f32 %v354_v3, %v353_v2  ;;  %v202_v5 = vmul.f32 %v353_v2, %v353_v2  ;;  %v203_v6 = vmul.f32 %v354_v3, %v354_v3 }
  0x14   : > { %v193_v7 = vrot.slane %v192_v4, 4  ;;  %v204_v8 = vadd.f32 %v203_v6, %v202_v5  ;;  %v191_v17 = vld [vmem:[#allocation2] sm:$0x1]  ;;  %v201_v20 = vld [vmem:[#allocation3] sm:$0x1] }
  0x16   : > { %v194_v9 = vadd.f32 %v193_v7, %v192_v4  ;;  %v205_v10 = vrot.slane %v204_v8, 4 }
  0x18   : > { %v195_v11 = vrot.slane %v194_v9, 2  ;;  %v206_v12 = vadd.f32 %v205_v10, %v204_v8 }
  0x1a   : > { %v196_v13 = vadd.f32 %v195_v11, %v194_v9  ;;  %v207_v14 = vrot.slane %v206_v12, 2 }
  0x1c   : > { %v197_v15 = vrot.slane %v196_v13, 1  ;;  %v208_v16 = vadd.f32 %v207_v14, %v206_v12 }
  0x1e   : > { %v198_v18 = vadd.f32 %v197_v15, %v196_v13  ;;  %v209_v19 = vrot.slane %v208_v16, 1 }
  0x20   : > { %v199_v21 = vadd.f32 %v198_v18, %v191_v17  ;;  %v210_v22 = vadd.f32 %v209_v19, %v208_v16 }
  0x22   : > { %200 = vst [vmem:[#allocation2] sm:$0x1] %v199_v21  ;;  %v211_v23 = vadd.f32 %v210_v22, %v201_v20 }
  0x24   : > { %212 = vst [vmem:[#allocation3] sm:$0x1] %v211_v23 }
  0x29   : > { %v216_v24 = vld [vmem:[#allocation2] sm:$0x1] }
  0x2a   : > { %v218_v25 = vsel %vm217_vm0, %v216_v24, 0.0 }
  0x2b   : > { %219 = vadd.xlane.f32.xlu0 %v218_v25  ;;  %v221_v26 = vld [vmem:[#allocation3] sm:$0x1] }
  0x2c   : > { %v222_v27 = vsel %vm217_vm0, %v221_v26, 0.0 }
  0x2f   : > { %223 = vadd.xlane.f32.xlu0 %v222_v27 }
  0xb4   : > { %v220_v31 = vpop.xlane.xlu0 %219 }
  0xb5   : > { %v225_v32 = vmul.f32 0.00048828125, %v220_v31 }
  0xb7   : > { %v234_v33 = vrot.slane %v225_v32, %v233_v30  ;;  %v227_v35 = vmul.f32 %v225_v32, %v225_v32 }
  0xb8   : > { %v224_v34 = vpop.xlane.xlu0 %223 }
  0xb9   : > { %235 = vst [vmem:[%s176_s19] sm:$0xff] %v234_v33  ;;  %v226_v36 = vmul.f32 0.00048828125, %v224_v34 }
  0xbb   : > { %v228_v37 = vsub.f32 %v226_v36, %v227_v35 }
  0xbd   : > { %v229_v38 = vadd.f32 1e-05, %v228_v37 }
  0xbf   : > { %380 = vrsqrt.f32 %v229_v38 }
  0xcc   : > { %v381_v39 = vpop.eup %380 }
  0xcd   : > { %v239_v40 = vrot.slane %v381_v39, %v233_v30 }
  0xcf   : > { %240 = vst [vmem:[%s180_s22] sm:$0xff] %v239_v40 }
  0xd0 PF: > { %s13_s11 = sadd.s32 1, %s404_s11   ;;  %s466_s9 = smov %s400_s10 }
  0xd1   : > { %p10_p5 = scmp.ge.s32.totalorder %s13_s11, 4   ;;  %s467_s10 = smov %s469_s12 }
  0xd3   :  { %12 = sbr.rel (!%p10_p5) target bundleno = 2 (0x2), region = 74 }

// kernel: _lambda_.5
= control target key start
LH: loop header
LB: loop body
LE: loop exit
PB: predicated region body
PF: predicated region fallthrough
CT: control target
= control target key end

     0   :  { %vm141_vm0 = vcmask 1043456   ;;  %vm116_vm1 = vcmask 588800   ;;  %vm306_vm2 = vcmask 60416   ;;  %s514_s18 = smov 120   ;;  %s752_s1 = inlined_call_operand.vmem [shape: bf16[72,16], index: 1, kind: input, shape index: {}]   ;;  %s753_s0 = inlined_call_operand.vmem [shape: bf16[128,72], index: 0, kind: input, shape index: {}]   ;;  %s754_s2 = inlined_call_operand.vmem [shape: f32[1,16], index: 2, kind: input, shape index: {}]   ;;  %s755_s3 = inlined_call_operand.vmem [shape: bf16[128,8], index: 3, kind: output, shape index: {0}]   ;;  %s756_s4 = inlined_call_operand.vmem [shape: bf16[128,8], index: 4, kind: output, shape index: {1}]  }
   0x1   :  { %v501_v0 = vld [vmem:[%s752_s1 + $0x20] ss:$0 sps:$4 sm:$0xff]   ;;  %v502_v1 = vld [vmem:[%s752_s1 + $0x18] sm:$0xff]   ;;  %v503_v3 = vld [vmem:[%s752_s1 + $0x10] sm:$0xff]  }
   0x2   :  { %498 = vmatprep.subr.msk.bf16.mxu0 %vm141_vm0, %v501_v0  ;;  %499 = vmatprep.subr.msk.bf16.mxu1 %vm141_vm0, %v501_v0  ;;  %v143_v2 = vsel %vm141_vm0, %v501_v0, 0  ;;  %v506_v4 = vld [vmem:[%s753_s0] sm:$0xff]   ;;  %v504_v6 = vld [vmem:[%s752_s1 + $0x8] sm:$0xff]   ;;  %v510_v10 = vld [vmem:[%s753_s0 + $0x10] sm:$0xff]  }
   0x3   :  { %463 = vmatpush3.bf16.msra.mxu0 %v143_v2  ;;  %493 = vmatpush3.bf16.msra.mxu1 %v143_v2  ;;  %v507_v5 = vld [vmem:[%s753_s0 + $0x20] sm:$0xff]   ;;  %v508_v8 = vld [vmem:[%s753_s0 + $0x8] sm:$0xff]   ;;  %v512_v11 = vld [vmem:[%s753_s0 + $0x30] sm:$0xff]  }
   0x4   :  { %464 = vmatprep.subr.bf16.mxu0 %v502_v1  ;;  %489 = vmatprep.subr.bf16.mxu1 %v502_v1  ;;  %v505_v7 = vld [vmem:[%s752_s1] sm:$0xff]   ;;  %v509_v9 = vld [vmem:[%s753_s0 + $0x28] sm:$0xff]   ;;  %v511_v12 = vld [vmem:[%s753_s0 + $0x18] sm:$0xff]  }
   0x5   :  { %472 = vmatprep.mubr.msk.bf16.mxu0 %vm116_vm1, %v506_v4  ;;  %480 = vmatprep.mubr.msk.bf16.mxu1 %vm116_vm1, %v507_v5  ;;  %v513_v13 = vld [vmem:[%s753_s0 + $0x38] sm:$0xff]   ;;  %v590_v14 = vld [vmem:[%s754_s2] ss:$0 sm:$0xff] }
   0x7   :  { %465 = vmatpush3.bf16.msra.mxu0 %v502_v1  ;;  %494 = vmatpush3.bf16.msra.mxu1 %v502_v1 }
   0x8   :  { %466 = vmatprep.subr.bf16.mxu0 %v503_v3  ;;  %490 = vmatprep.subr.bf16.mxu1 %v503_v3 }
   0xb   :  { %467 = vmatpush3.bf16.msra.mxu0 %v503_v3  ;;  %495 = vmatpush3.bf16.msra.mxu1 %v503_v3 }
   0xc   :  { %468 = vmatprep.subr.bf16.mxu0 %v504_v6  ;;  %491 = vmatprep.subr.bf16.mxu1 %v504_v6 }
   0xf   :  { %469 = vmatpush3.bf16.msra.mxu0 %v504_v6  ;;  %496 = vmatpush3.bf16.msra.mxu1 %v504_v6 }
  0x10   :  { %470 = vmatprep.subr.bf16.mxu0 %v505_v7  ;;  %492 = vmatprep.subr.bf16.mxu1 %v505_v7 }
  0x13   :  { %471 = vmatpush3.bf16.msra.mxu0 %v505_v7  ;;  %497 = vmatpush3.bf16.msra.mxu1 %v505_v7 }
  0x16   :  { %473 = vmatmul.mubr.msk.bf16.vlgmr.msra.gmra.mxu0 %vm116_vm1, %v508_v8  ;;  %481 = vmatmul.mubr.msk.bf16.vlgmr.msra.gmra.mxu1 %vm116_vm1, %v509_v9 }
  0x17   :  { %476 = vmatprep.mubr.msk.bf16.mxu0 %vm116_vm1, %v510_v10  ;;  %484 = vmatprep.mubr.msk.bf16.mxu1 %vm116_vm1, %v512_v11 }
  0x1e   :  { %477 = vmatmul.mubr.msk.bf16.gmra.mxu0 %vm116_vm1, %v511_v12  ;;  %485 = vmatmul.mubr.msk.bf16.gmra.mxu1 %vm116_vm1, %v513_v13 }
  0xd6   :  { %v474_v15 = vpop.f32.mrf.mxu0  ;;  %v482_v16 = vpop.f32.mrf.mxu1 }
  0xd7   :  { %v188_v17 = vadd.f32 %v474_v15, %v590_v14  ;;  %v220_v18 = vadd.f32 %v482_v16, %v590_v14 }
  0xd8   :  { %v179_v19 = vpop.f32.mrf.mxu0  ;;  %v211_v20 = vpop.f32.mrf.mxu1 }
  0xd9   :  { %v435_v21 = vpack.c.bf16 %v188_v17, %v188_v17  ;;  %v443_v22 = vpack.c.bf16 %v220_v18, %v220_v18  ;;  %v180_v23 = vadd.f32 %v590_v14, %v179_v19  ;;  %v212_v24 = vadd.f32 %v590_v14, %v211_v20 }
  0xda   :  { %v475_v25 = vpop.f32.mrf.mxu0  ;;  %v483_v26 = vpop.f32.mrf.mxu1 }
  0xdb   :  { %309 = vst.msk [vmem:[%s755_s3 + $0x8] sm:$0xf] %vm306_vm2, %v435_v21  ;;  %317 = vst.msk [vmem:[%s755_s3 + $0x28] sm:$0xf] %vm306_vm2, %v443_v22  ;;  %v433_v27 = vpack.c.bf16 %v180_v23, %v180_v23  ;;  %v441_v28 = vpack.c.bf16 %v212_v24, %v212_v24  ;;  %v191_v29 = vadd.f32 %v475_v25, %v590_v14  ;;  %343 = vrot.lane.b32.xlu0 %v443_v22, %s514_s18 }
  0xdc   :  { %v223_v30 = vadd.f32 %v483_v26, %v590_v14  ;;  %327 = vrot.lane.b32.xlu1 %v435_v21, %s514_s18  ;;  %v182_v31 = vpop.f32.mrf.mxu0  ;;  %v214_v32 = vpop.f32.mrf.mxu1 }
  0xdd   :  { %307 = vst.msk [vmem:[%s755_s3] sm:$0xf] %vm306_vm2, %v433_v27  ;;  %315 = vst.msk [vmem:[%s755_s3 + $0x20] sm:$0xf] %vm306_vm2, %v441_v28  ;;  %v436_v33 = vpack.c.bf16 %v191_v29, %v191_v29  ;;  %v183_v35 = vadd.f32 %v590_v14, %v182_v31  ;;  %v215_v36 = vadd.f32 %v590_v14, %v214_v32 }
  0xde   :  { %v444_v34 = vpack.c.bf16 %v223_v30, %v223_v30  ;;  %v478_v37 = vpop.f32.mrf.mxu0  ;;  %v486_v38 = vpop.f32.mrf.mxu1 }
  0xdf   :  { %310 = vst.msk [vmem:[%s755_s3 + $0xc] sm:$0xf] %vm306_vm2, %v436_v33  ;;  %v434_v39 = vpack.c.bf16 %v183_v35, %v183_v35  ;;  %v442_v40 = vpack.c.bf16 %v215_v36, %v215_v36  ;;  %v204_v41 = vadd.f32 %v478_v37, %v590_v14  ;;  %323 = vrot.lane.b32.xlu0 %v433_v27, %s514_s18 }
  0xe0   :  { %318 = vst.msk [vmem:[%s755_s3 + $0x2c] sm:$0xf] %vm306_vm2, %v444_v34  ;;  %v236_v42 = vadd.f32 %v486_v38, %v590_v14  ;;  %329 = vrot.lane.b32.xlu1 %v436_v33, %s514_s18  ;;  %v195_v43 = vpop.f32.mrf.mxu0  ;;  %v227_v44 = vpop.f32.mrf.mxu1 }
  0xe1   :  { %308 = vst.msk [vmem:[%s755_s3 + $0x4] sm:$0xf] %vm306_vm2, %v434_v39  ;;  %316 = vst.msk [vmem:[%s755_s3 + $0x24] sm:$0xf] %vm306_vm2, %v442_v40  ;;  %v439_v45 = vpack.c.bf16 %v204_v41, %v204_v41  ;;  %v196_v46 = vadd.f32 %v590_v14, %v195_v43  ;;  %v228_v48 = vadd.f32 %v590_v14, %v227_v44 }
  0xe2   :  { %v447_v47 = vpack.c.bf16 %v236_v42, %v236_v42  ;;  %v479_v49 = vpop.f32.mrf.mxu0  ;;  %v487_v50 = vpop.f32.mrf.mxu1 }
  0xe3   :  { %313 = vst.msk [vmem:[%s755_s3 + $0x18] sm:$0xf] %vm306_vm2, %v439_v45  ;;  %v437_v51 = vpack.c.bf16 %v196_v46, %v196_v46  ;;  %v207_v52 = vadd.f32 %v479_v49, %v590_v14  ;;  %339 = vrot.lane.b32.xlu0 %v441_v28, %s514_s18  ;;  %v445_v53 = vpack.c.bf16 %v228_v48, %v228_v48 }
  0xe4   :  { %321 = vst.msk [vmem:[%s755_s3 + $0x38] sm:$0xf] %vm306_vm2, %v447_v47  ;;  %v239_v54 = vadd.f32 %v487_v50, %v590_v14  ;;  %345 = vrot.lane.b32.xlu1 %v444_v34, %s514_s18  ;;  %v198_v55 = vpop.f32.mrf.mxu0  ;;  %v230_v56 = vpop.f32.mrf.mxu1 }
  0xe5   :  { %311 = vst.msk [vmem:[%s755_s3 + $0x10] sm:$0xf] %vm306_vm2, %v437_v51  ;;  %v440_v57 = vpack.c.bf16 %v207_v52, %v207_v52  ;;  %v199_v58 = vadd.f32 %v590_v14, %v198_v55  ;;  %319 = vst.msk [vmem:[%s755_s3 + $0x30] sm:$0xf] %vm306_vm2, %v445_v53  ;;  %v231_v60 = vadd.f32 %v590_v14, %v230_v56 }
  0xe6   :  { %v448_v59 = vpack.c.bf16 %v239_v54, %v239_v54 }
  0xe7   :  { %314 = vst.msk [vmem:[%s755_s3 + $0x1c] sm:$0xf] %vm306_vm2, %v440_v57  ;;  %v438_v61 = vpack.c.bf16 %v199_v58, %v199_v58  ;;  %325 = vrot.lane.b32.xlu0 %v434_v39, %s514_s18  ;;  %v446_v62 = vpack.c.bf16 %v231_v60, %v231_v60 }
  0xe8   :  { %322 = vst.msk [vmem:[%s755_s3 + $0x3c] sm:$0xf] %vm306_vm2, %v448_v59  ;;  %341 = vrot.lane.b32.xlu1 %v442_v40, %s514_s18 }
  0xe9   :  { %312 = vst.msk [vmem:[%s755_s3 + $0x14] sm:$0xf] %vm306_vm2, %v438_v61  ;;  %320 = vst.msk [vmem:[%s755_s3 + $0x34] sm:$0xf] %vm306_vm2, %v446_v62 }
  0xeb   :  { %335 = vrot.lane.b32.xlu0 %v439_v45, %s514_s18 }
  0xec   :  { %337 = vrot.lane.b32.xlu1 %v440_v57, %s514_s18 }
  0xef   :  { %331 = vrot.lane.b32.xlu0 %v437_v51, %s514_s18 }
  0xf0   :  { %333 = vrot.lane.b32.xlu1 %v438_v61, %s514_s18 }
  0xf3   :  { %347 = vrot.lane.b32.xlu0 %v445_v53, %s514_s18 }
  0xf4   :  { %349 = vrot.lane.b32.xlu1 %v446_v62, %s514_s18 }
  0xf7   :  { %351 = vrot.lane.b32.xlu0 %v447_v47, %s514_s18 }
  0xf8   :  { %353 = vrot.lane.b32.xlu1 %v448_v59, %s514_s18 }
 0x14d   :  { %v344_v63 = vpop.permute.xlu0 %343 }
 0x14e   :  { %381 = vst.msk [vmem:[%s756_s4 + $0x28] sm:$0xf] %vm306_vm2, %v344_v63  ;;  %v328_v0 = vpop.permute.xlu1 %327 }
 0x14f   :  { %373 = vst.msk [vmem:[%s756_s4 + $0x8] sm:$0xf] %vm306_vm2, %v328_v0 }
 0x151   :  { %v324_v1 = vpop.permute.xlu0 %323 }
 0x152   :  { %v330_v2 = vpop.permute.xlu1 %329  ;;  %371 = vst.msk [vmem:[%s756_s4] sm:$0xf] %vm306_vm2, %v324_v1 }
 0x153   :  { %374 = vst.msk [vmem:[%s756_s4 + $0xc] sm:$0xf] %vm306_vm2, %v330_v2 }
 0x155   :  { %v340_v3 = vpop.permute.xlu0 %339 }
 0x156   :  { %v346_v4 = vpop.permute.xlu1 %345  ;;  %379 = vst.msk [vmem:[%s756_s4 + $0x20] sm:$0xf] %vm306_vm2, %v340_v3 }
 0x157   :  { %382 = vst.msk [vmem:[%s756_s4 + $0x2c] sm:$0xf] %vm306_vm2, %v346_v4 }
 0x159   :  { %v326_v5 = vpop.permute.xlu0 %325 }
 0x15a   :  { %v342_v6 = vpop.permute.xlu1 %341  ;;  %372 = vst.msk [vmem:[%s756_s4 + $0x4] sm:$0xf] %vm306_vm2, %v326_v5 }
 0x15b   :  { %380 = vst.msk [vmem:[%s756_s4 + $0x24] sm:$0xf] %vm306_vm2, %v342_v6 }
 0x15d   :  { %v336_v7 = vpop.permute.xlu0 %335 }
 0x15e   :  { %v338_v8 = vpop.permute.xlu1 %337  ;;  %377 = vst.msk [vmem:[%s756_s4 + $0x18] sm:$0xf] %vm306_vm2, %v336_v7 }
 0x15f   :  { %378 = vst.msk [vmem:[%s756_s4 + $0x1c] sm:$0xf] %vm306_vm2, %v338_v8 }
 0x161   :  { %v332_v9 = vpop.permute.xlu0 %331 }
 0x162   :  { %v334_v10 = vpop.permute.xlu1 %333  ;;  %375 = vst.msk [vmem:[%s756_s4 + $0x10] sm:$0xf] %vm306_vm2, %v332_v9 }
 0x163   :  { %376 = vst.msk [vmem:[%s756_s4 + $0x14] sm:$0xf] %vm306_vm2, %v334_v10 }
 0x165   :  { %v348_v11 = vpop.permute.xlu0 %347 }
 0x166   :  { %v350_v12 = vpop.permute.xlu1 %349  ;;  %383 = vst.msk [vmem:[%s756_s4 + $0x30] sm:$0xf] %vm306_vm2, %v348_v11 }
 0x167   :  { %384 = vst.msk [vmem:[%s756_s4 + $0x34] sm:$0xf] %vm306_vm2, %v350_v12 }
 0x169   :  { %v352_v13 = vpop.permute.xlu0 %351 }
 0x16a   :  { %v354_v14 = vpop.permute.xlu1 %353  ;;  %385 = vst.msk [vmem:[%s756_s4 + $0x38] sm:$0xf] %vm306_vm2, %v352_v13 }
 0x16b   :  { %386 = vst.msk [vmem:[%s756_s4 + $0x3c] sm:$0xf] %vm306_vm2, %v354_v14 }

</bundles_post_ra>
